<compile_context>
chip_gen: v5e
topology: v5e:2x2
jax: 0.10.0
libtpu: 0.0.40
codegen_flags: <defaults>
</compile_context>

<pallas_src>
import functools

import jax
import jax.numpy as jnp
from jax.experimental import pallas as pl
from jax.experimental.pallas import tpu as pltpu

LANE = 128


def _leaky_relu(h):
    return jnp.where(h > 0, h, 0.2 * h)


# -----------------------------------------------------------------------------
# Kernel: one batch tile of the fused (s, t) conditioner MLP + affine coupling.
# Transposed layout: activations are (features, TB) so batch is lane-dense.
# -----------------------------------------------------------------------------
def affine_half_flow_kernel(x0t_ref, x1t_ref, w0_ref, w12_ref, w3_ref, b_ref,
                            zt_ref, logdet_ref, *, d2, parity):
    x0t = x0t_ref[...]                        # (d2, TB)  conditioner input half
    x1t = x1t_ref[...]                        # (d2, TB)  half to transform

    w0 = w0_ref[...]                          # (2nh, d2)   [sW0^T ; tW0^T]
    w1 = w12_ref[0]                           # (2nh, 2nh)  blockdiag(sW1, tW1)^T
    w2 = w12_ref[1]                           # (2nh, 2nh)  blockdiag(sW2, tW2)^T
    w3 = w3_ref[...]                          # (2*d2, 2nh) blockdiag(sW3, tW3)^T
    b0 = b_ref[:, 0:1]                        # (2nh, 1)
    b1 = b_ref[:, 1:2]
    b2 = b_ref[:, 2:3]
    b3 = b_ref[0:2 * d2, 3:4]                 # (2*d2, 1)

    # Fused s/t MLP (transposed): h = W^T @ x + b, LeakyReLU(0.2) between.
    h = jnp.dot(w0, x0t, preferred_element_type=jnp.float32) + b0
    h = _leaky_relu(h)
    h = jnp.dot(w1, h, preferred_element_type=jnp.float32) + b1
    h = _leaky_relu(h)
    h = jnp.dot(w2, h, preferred_element_type=jnp.float32) + b2
    h = _leaky_relu(h)
    st = jnp.dot(w3, h, preferred_element_type=jnp.float32) + b3   # (2*d2, TB)

    s = st[0:d2, :]                           # s-branch rows
    t = st[d2:2 * d2, :]                      # t-branch rows
    z1t = jnp.exp(s) * x1t + t                # affine coupling

    # Fused concat: z = cat([z0, z1], dim=1) in the original layout.
    if parity:
        zt_ref[...] = jnp.concatenate([z1t, x0t], axis=0)
    else:
        zt_ref[...] = jnp.concatenate([x0t, z1t], axis=0)

    # log_det = sum(s, dim=1) -> cheap sublane reduce in the transposed layout.
    logdet_ref[...] = jnp.sum(s, axis=0, keepdims=True)


# -----------------------------------------------------------------------------
# Parameter fusion / packing (pure JAX, layout-only).
# -----------------------------------------------------------------------------
def _block_diag(a, b):
    top = jnp.concatenate([a, jnp.zeros((a.shape[0], b.shape[1]), a.dtype)], axis=1)
    bot = jnp.concatenate([jnp.zeros((b.shape[0], a.shape[1]), a.dtype), b], axis=1)
    return jnp.concatenate([top, bot], axis=0)


def pack_params(s_params, t_params):
    """Fuse the s/t conditioner MLPs into one transposed block-diagonal MLP and
    pack the 16 weight/bias tensors into 4 arrays (fewer, bigger DMAs)."""
    sw0, sb0, sw1, sb1, sw2, sb2, sw3, sb3 = s_params
    tw0, tb0, tw1, tb1, tw2, tb2, tw3, tb3 = t_params
    nh = sw1.shape[0]
    nout = sw3.shape[1]

    w0 = jnp.concatenate([sw0.T, tw0.T], axis=0)           # (2nh, nin)
    w1 = _block_diag(sw1.T, tw1.T)                         # (2nh, 2nh)
    w2 = _block_diag(sw2.T, tw2.T)                         # (2nh, 2nh)
    w12 = jnp.stack([w1, w2], axis=0)                      # (2, 2nh, 2nh)
    w3 = _block_diag(sw3.T, tw3.T)                         # (2nout, 2nh)

    b0 = jnp.concatenate([sb0[0], tb0[0]])                 # (2nh,)
    b1 = jnp.concatenate([sb1[0], tb1[0]])
    b2 = jnp.concatenate([sb2[0], tb2[0]])
    b3 = jnp.concatenate([sb3[0], tb3[0]])                 # (2nout,)
    b3 = jnp.pad(b3, (0, 2 * nh - 2 * nout))
    bpack = jnp.stack([b0, b1, b2, b3], axis=1)            # (2nh, 4)
    return w0, w12, w3, bpack


# -----------------------------------------------------------------------------
# Wrapper
# -----------------------------------------------------------------------------
def affine_half_flow_forward(x, s_params, t_params, parity):
    """Forward of AffineHalfFlow. Returns (z, log_det) matching the PyTorch module."""
    B, dim = x.shape
    d2 = dim // 2
    nh = s_params[2].shape[0]
    nh2 = 2 * nh

    # Even/odd split + parity swap (wrapper-side layout glue).
    x0, x1 = x[:, ::2], x[:, 1::2]
    if parity:
        x0, x1 = x1, x0

    # Lane-dense layout: batch on the last (lane) axis.
    x0t, x1t = x0.T, x1.T                                   # (d2, B)

    # Batch tile on the lane axis; pad batch to a multiple of the tile.
    if B > 1024:
        TB = 1024
    else:
        TB = max(LANE, -(-B // LANE) * LANE)
    B_pad = -(-B // TB) * TB
    if B_pad != B:
        pad = ((0, 0), (0, B_pad - B))
        x0t = jnp.pad(x0t, pad)
        x1t = jnp.pad(x1t, pad)

    w0, w12, w3, bpack = pack_params(s_params, t_params)

    kernel = functools.partial(affine_half_flow_kernel, d2=d2, parity=bool(parity))

    flops = 2 * B_pad * (nh2 * d2 + 2 * nh2 * nh2 + nh2 * 2 * d2) + 10 * B_pad * nh2
    bytes_accessed = 4 * (B_pad * (2 * d2 + dim + 1)
                          + w0.size + w12.size + w3.size + bpack.size)
    cost = pl.CostEstimate(flops=int(flops),
                           transcendentals=int(B_pad * d2),
                           bytes_accessed=int(bytes_accessed))

    zt, logdett = pl.pallas_call(
        kernel,
        out_shape=(
            jax.ShapeDtypeStruct((dim, B_pad), jnp.float32),
            jax.ShapeDtypeStruct((1, B_pad), jnp.float32),
        ),
        grid_spec=pltpu.PrefetchScalarGridSpec(
            num_scalar_prefetch=0,
            grid=(B_pad // TB,),
            in_specs=[
                pl.BlockSpec((d2, TB), lambda i: (0, i)),          # x0^T (pipelined)
                pl.BlockSpec((d2, TB), lambda i: (0, i)),          # x1^T (pipelined)
                pl.BlockSpec((nh2, d2), lambda i: (0, 0)),         # w0   (resident)
                pl.BlockSpec((2, nh2, nh2), lambda i: (0, 0, 0)),  # w1/w2 (resident)
                pl.BlockSpec((2 * d2, nh2), lambda i: (0, 0)),     # w3   (resident)
                pl.BlockSpec((nh2, 4), lambda i: (0, 0)),          # biases (resident)
            ],
            out_specs=(
                pl.BlockSpec((dim, TB), lambda i: (0, i)),         # z^T (lane-dense)
                pl.BlockSpec((1, TB), lambda i: (0, i)),           # log_det^T
            ),
        ),
        compiler_params=pltpu.CompilerParams(
            dimension_semantics=("parallel",)),
        cost_estimate=cost,
    )(x0t, x1t, w0, w12, w3, bpack)

    z = zt.T[:B]
    log_det = logdett[0, :B]
    return z, log_det


# -----------------------------------------------------------------------------
# Reference (pure JAX, mirrors the PyTorch module exactly) + param init
# -----------------------------------------------------------------------------
def _mlp_ref(x, w0, b0, w1, b1, w2, b2, w3, b3):
    h = _leaky_relu(x @ w0 + b0)
    h = _leaky_relu(h @ w1 + b1)
    h = _leaky_relu(h @ w2 + b2)
    return h @ w3 + b3


def reference_forward(x, s_params, t_params, parity):
    x0, x1 = x[:, ::2], x[:, 1::2]
    if parity:
        x0, x1 = x1, x0
    s = _mlp_ref(x0, *s_params)
    t = _mlp_ref(x0, *t_params)
    z0 = x0
    z1 = jnp.exp(s) * x1 + t
    if parity:
        z0, z1 = z1, z0
    z = jnp.concatenate([z0, z1], axis=1)
    return z, jnp.sum(s, axis=1)


def init_mlp_params(key, nin, nout, nh):
    """Deterministic init of a 4-layer MLP (Linear/LeakyReLU x3 + Linear).
    Weights stored (in, out), biases (1, out) — torch Linear equivalent."""
    ks = jax.random.split(key, 8)

    def lin(kw, kb, fan_in, fan_out):
        bound = 1.0 / jnp.sqrt(fan_in)
        w = jax.random.uniform(kw, (fan_in, fan_out), jnp.float32, -bound, bound)
        b = jax.random.uniform(kb, (1, fan_out), jnp.float32, -bound, bound)
        return w, b

    w0, b0 = lin(ks[0], ks[1], nin, nh)
    w1, b1 = lin(ks[2], ks[3], nh, nh)
    w2, b2 = lin(ks[4], ks[5], nh, nh)
    w3, b3 = lin(ks[6], ks[7], nh, nout)
    return (w0, b0, w1, b1, w2, b2, w3, b3)


if __name__ == "__main__":
    dim = 4        # self.dim
    nh = 24        # hidden width of the MLP conditioners
    B = 8          # small batch

    key = jax.random.PRNGKey(0)
    kx, ks, kt = jax.random.split(key, 3)

    x = jax.random.normal(kx, (B, dim), dtype=jnp.float32)
    s_params = init_mlp_params(ks, dim // 2, dim // 2, nh)
    t_params = init_mlp_params(kt, dim // 2, dim // 2, nh)

    for parity in (0, 1):
        z, log_det = affine_half_flow_forward(x, s_params, t_params, parity)
        z = jax.block_until_ready(z)
        log_det = jax.block_until_ready(log_det)
        z_ref, ld_ref = reference_forward(x, s_params, t_params, parity)
        assert z.shape == (B, dim) and log_det.shape == (B,)
        assert jnp.allclose(z, z_ref, atol=1e-4, rtol=1e-4)
        assert jnp.allclose(log_det, ld_ref, atol=1e-4, rtol=1e-4)

    # Larger batch exercises the lane-padding path (still small & deterministic).
    B2 = 300
    x2 = jax.random.normal(jax.random.PRNGKey(1), (B2, dim), dtype=jnp.float32)
    z2, ld2 = affine_half_flow_forward(x2, s_params, t_params, 0)
    z2 = jax.block_until_ready(z2)
    ld2 = jax.block_until_ready(ld2)
    z2_ref, ld2_ref = reference_forward(x2, s_params, t_params, 0)
    assert jnp.allclose(z2, z2_ref, atol=1e-4, rtol=1e-4)
    assert jnp.allclose(ld2, ld2_ref, atol=1e-4, rtol=1e-4)

    print("KERNEL_OK")
</pallas_src>

<mosaic_0001>
module attributes {stable_mosaic.version = 11 : i64} {
  func.func @affine_half_flow_kernel(%arg0: i32, %arg1: memref<2x128xf32, #tpu.memory_space<vmem>>, %arg2: memref<2x128xf32, #tpu.memory_space<vmem>>, %arg3: memref<48x2xf32, #tpu.memory_space<vmem>>, %arg4: memref<2x48x48xf32, #tpu.memory_space<vmem>>, %arg5: memref<4x48xf32, #tpu.memory_space<vmem>>, %arg6: memref<48x4xf32, #tpu.memory_space<vmem>>, %arg7: memref<4x128xf32, #tpu.memory_space<vmem>>, %arg8: memref<1x128xf32, #tpu.memory_space<vmem>>) attributes {dimension_semantics = [#tpu.dimension_semantics<parallel>], iteration_bounds = array<i64: 1>, scalar_prefetch = 0 : i64, scratch_operands = 0 : i64, tpu.core_type = #tpu.core_type<tc>, window_params = [{transform_indices = @transform_0, window_bounds = array<i64: 2, 128>}, {transform_indices = @transform_1, window_bounds = array<i64: 2, 128>}, {pipeline_mode = #tpu.pipeline_mode<synchronous>, transform_indices = @transform_2, window_bounds = array<i64: 48, 2>}, {pipeline_mode = #tpu.pipeline_mode<synchronous>, transform_indices = @transform_3, window_bounds = array<i64: 2, 48, 48>}, {pipeline_mode = #tpu.pipeline_mode<synchronous>, transform_indices = @transform_4, window_bounds = array<i64: 4, 48>}, {pipeline_mode = #tpu.pipeline_mode<synchronous>, transform_indices = @transform_5, window_bounds = array<i64: 48, 4>}, {transform_indices = @transform_6, window_bounds = array<i64: 4, 128>}, {transform_indices = @transform_7, window_bounds = array<i64: 1, 128>}]} {
    %c0 = arith.constant 0 : index
    %c0_0 = arith.constant 0 : index
    %0 = vector.load %arg1[%c0, %c0_0] : memref<2x128xf32, #tpu.memory_space<vmem>>, vector<2x128xf32>
    %c0_1 = arith.constant 0 : index
    %c0_2 = arith.constant 0 : index
    %1 = vector.load %arg2[%c0_1, %c0_2] : memref<2x128xf32, #tpu.memory_space<vmem>>, vector<2x128xf32>
    %c0_3 = arith.constant 0 : index
    %c0_4 = arith.constant 0 : index
    %2 = vector.load %arg3[%c0_3, %c0_4] : memref<48x2xf32, #tpu.memory_space<vmem>>, vector<48x2xf32>
    %c0_5 = arith.constant 0 : index
    %c0_6 = arith.constant 0 : index
    %c0_7 = arith.constant 0 : index
    %3 = vector.load %arg4[%c0_5, %c0_6, %c0_7] : memref<2x48x48xf32, #tpu.memory_space<vmem>>, vector<1x48x48xf32>
    %4 = vector.shape_cast %3 : vector<1x48x48xf32> to vector<48x48xf32>
    %c1 = arith.constant 1 : index
    %c0_8 = arith.constant 0 : index
    %c0_9 = arith.constant 0 : index
    %5 = vector.load %arg4[%c1, %c0_8, %c0_9] : memref<2x48x48xf32, #tpu.memory_space<vmem>>, vector<1x48x48xf32>
    %6 = vector.shape_cast %5 : vector<1x48x48xf32> to vector<48x48xf32>
    %c0_10 = arith.constant 0 : index
    %c0_11 = arith.constant 0 : index
    %7 = vector.load %arg5[%c0_10, %c0_11] : memref<4x48xf32, #tpu.memory_space<vmem>>, vector<4x48xf32>
    %c0_12 = arith.constant 0 : index
    %c0_13 = arith.constant 0 : index
    %8 = vector.load %arg6[%c0_12, %c0_13] : memref<48x4xf32, #tpu.memory_space<vmem>>, vector<48x1xf32>
    %c0_14 = arith.constant 0 : index
    %c1_15 = arith.constant 1 : index
    %9 = vector.load %arg6[%c0_14, %c1_15] : memref<48x4xf32, #tpu.memory_space<vmem>>, vector<48x1xf32>
    %c0_16 = arith.constant 0 : index
    %c2 = arith.constant 2 : index
    %10 = vector.load %arg6[%c0_16, %c2] : memref<48x4xf32, #tpu.memory_space<vmem>>, vector<48x1xf32>
    %c0_17 = arith.constant 0 : index
    %c3 = arith.constant 3 : index
    %11 = vector.load %arg6[%c0_17, %c3] : memref<48x4xf32, #tpu.memory_space<vmem>>, vector<4x1xf32>
    %cst = arith.constant dense<0.000000e+00> : vector<48x128xf32>
    %12 = tpu.matmul %2, %0, %cst {dimension_numbers = #tpu.dot_dimension_numbers<[1], [0], [0], [1], [0, 0, 1, 1], [], []>} : vector<48x2xf32>, vector<2x128xf32>, vector<48x128xf32> -> vector<48x128xf32>
    %13 = vector.broadcast %8 : vector<48x1xf32> to vector<48x128xf32>
    %14 = arith.addf %12, %13 : vector<48x128xf32>
    %cst_18 = arith.constant 0.000000e+00 : f32
    %15 = vector.broadcast %cst_18 : f32 to vector<48x128xf32>
    %16 = arith.cmpf ogt, %14, %15 : vector<48x128xf32>
    %cst_19 = arith.constant 2.000000e-01 : f32
    %17 = vector.broadcast %cst_19 : f32 to vector<48x128xf32>
    %18 = arith.mulf %17, %14 : vector<48x128xf32>
    %19 = arith.select %16, %14, %18 : vector<48x128xi1>, vector<48x128xf32>
    %cst_20 = arith.constant dense<0.000000e+00> : vector<48x128xf32>
    %20 = tpu.matmul %4, %19, %cst_20 {dimension_numbers = #tpu.dot_dimension_numbers<[1], [0], [0], [1], [0, 0, 1, 1], [], []>} : vector<48x48xf32>, vector<48x128xf32>, vector<48x128xf32> -> vector<48x128xf32>
    %21 = vector.broadcast %9 : vector<48x1xf32> to vector<48x128xf32>
    %22 = arith.addf %20, %21 : vector<48x128xf32>
    %cst_21 = arith.constant 0.000000e+00 : f32
    %23 = vector.broadcast %cst_21 : f32 to vector<48x128xf32>
    %24 = arith.cmpf ogt, %22, %23 : vector<48x128xf32>
    %cst_22 = arith.constant 2.000000e-01 : f32
    %25 = vector.broadcast %cst_22 : f32 to vector<48x128xf32>
    %26 = arith.mulf %25, %22 : vector<48x128xf32>
    %27 = arith.select %24, %22, %26 : vector<48x128xi1>, vector<48x128xf32>
    %cst_23 = arith.constant dense<0.000000e+00> : vector<48x128xf32>
    %28 = tpu.matmul %6, %27, %cst_23 {dimension_numbers = #tpu.dot_dimension_numbers<[1], [0], [0], [1], [0, 0, 1, 1], [], []>} : vector<48x48xf32>, vector<48x128xf32>, vector<48x128xf32> -> vector<48x128xf32>
    %29 = vector.broadcast %10 : vector<48x1xf32> to vector<48x128xf32>
    %30 = arith.addf %28, %29 : vector<48x128xf32>
    %cst_24 = arith.constant 0.000000e+00 : f32
    %31 = vector.broadcast %cst_24 : f32 to vector<48x128xf32>
    %32 = arith.cmpf ogt, %30, %31 : vector<48x128xf32>
    %cst_25 = arith.constant 2.000000e-01 : f32
    %33 = vector.broadcast %cst_25 : f32 to vector<48x128xf32>
    %34 = arith.mulf %33, %30 : vector<48x128xf32>
    %35 = arith.select %32, %30, %34 : vector<48x128xi1>, vector<48x128xf32>
    %cst_26 = arith.constant dense<0.000000e+00> : vector<4x128xf32>
    %36 = tpu.matmul %7, %35, %cst_26 {dimension_numbers = #tpu.dot_dimension_numbers<[1], [0], [0], [1], [0, 0, 1, 1], [], []>} : vector<4x48xf32>, vector<48x128xf32>, vector<4x128xf32> -> vector<4x128xf32>
    %37 = vector.broadcast %11 : vector<4x1xf32> to vector<4x128xf32>
    %38 = arith.addf %36, %37 : vector<4x128xf32>
    %39 = vector.extract_strided_slice %38 {offsets = [0, 0], sizes = [2, 128], strides = [1, 1]} : vector<4x128xf32> to vector<2x128xf32>
    %40 = vector.extract_strided_slice %38 {offsets = [2, 0], sizes = [2, 128], strides = [1, 1]} : vector<4x128xf32> to vector<2x128xf32>
    %41 = math.exp %39 : vector<2x128xf32>
    %42 = arith.mulf %41, %1 : vector<2x128xf32>
    %43 = arith.addf %42, %40 : vector<2x128xf32>
    %44 = tpu.concatenate %0, %43 in 0 : vector<2x128xf32>, vector<2x128xf32> -> vector<4x128xf32>
    %c0_27 = arith.constant 0 : index
    %c0_28 = arith.constant 0 : index
    %45 = vector.load %arg7[%c0_27, %c0_28] : memref<4x128xf32, #tpu.memory_space<vmem>>, vector<4x128xf32>
    tpu.vector_store %arg7[%c0_27, %c0_28], %44 {strides = array<i32>} : memref<4x128xf32, #tpu.memory_space<vmem>>, vector<4x128xf32>,
    %cst_29 = arith.constant dense<0.000000e+00> : vector<128xf32>
    %46 = vector.multi_reduction <add>, %39, %cst_29 [0] : vector<2x128xf32> to vector<128xf32>
    %47 = vector.shape_cast %46 : vector<128xf32> to vector<1x128xf32>
    %c0_30 = arith.constant 0 : index
    %c0_31 = arith.constant 0 : index
    %48 = vector.load %arg8[%c0_30, %c0_31] : memref<1x128xf32, #tpu.memory_space<vmem>>, vector<1x128xf32>
    tpu.vector_store %arg8[%c0_30, %c0_31], %47 {strides = array<i32>} : memref<1x128xf32, #tpu.memory_space<vmem>>, vector<1x128xf32>,
    return
  }
  func.func @transform_0(%arg0: i32) -> (i32, i32) {
    %c0_i32 = arith.constant 0 : i32
    %c0_i32_0 = arith.constant 0 : i32
    return %c0_i32, %arg0 : i32, i32
  }
  func.func @transform_1(%arg0: i32) -> (i32, i32) {
    %c0_i32 = arith.constant 0 : i32
    %c0_i32_0 = arith.constant 0 : i32
    return %c0_i32, %arg0 : i32, i32
  }
  func.func @transform_2(%arg0: i32) -> (i32, i32) {
    %c0_i32 = arith.constant 0 : i32
    %c0_i32_0 = arith.constant 0 : i32
    %c0_i32_1 = arith.constant 0 : i32
    return %c0_i32, %c0_i32_0 : i32, i32
  }
  func.func @transform_3(%arg0: i32) -> (i32, i32, i32) {
    %c0_i32 = arith.constant 0 : i32
    %c0_i32_0 = arith.constant 0 : i32
    %c0_i32_1 = arith.constant 0 : i32
    %c0_i32_2 = arith.constant 0 : i32
    return %c0_i32, %c0_i32_0, %c0_i32_1 : i32, i32, i32
  }
  func.func @transform_4(%arg0: i32) -> (i32, i32) {
    %c0_i32 = arith.constant 0 : i32
    %c0_i32_0 = arith.constant 0 : i32
    %c0_i32_1 = arith.constant 0 : i32
    return %c0_i32, %c0_i32_0 : i32, i32
  }
  func.func @transform_5(%arg0: i32) -> (i32, i32) {
    %c0_i32 = arith.constant 0 : i32
    %c0_i32_0 = arith.constant 0 : i32
    %c0_i32_1 = arith.constant 0 : i32
    return %c0_i32, %c0_i32_0 : i32, i32
  }
  func.func @transform_6(%arg0: i32) -> (i32, i32) {
    %c0_i32 = arith.constant 0 : i32
    %c0_i32_0 = arith.constant 0 : i32
    return %c0_i32, %arg0 : i32, i32
  }
  func.func @transform_7(%arg0: i32) -> (i32, i32) {
    %c0_i32 = arith.constant 0 : i32
    %c0_i32_0 = arith.constant 0 : i32
    return %c0_i32, %arg0 : i32, i32
  }
}

</mosaic_0001>

<bundles_post_ra>
// kernel: tpu_custom_call.1
= control target key start
LH: loop header
LB: loop body
LE: loop exit
PB: predicated region body
PF: predicated region fallthrough
CT: control target
= control target key end

     0   :  { %13 = vsyncpa [#allocation3], 0  ;;  %s820_s0 = inlined_call_operand.hbm [shape: f32[2,128], index: 0, kind: input, shape index: {}]   ;;  %s821_s1 = inlined_call_operand.hbm [shape: f32[2,128], index: 1, kind: input, shape index: {}]   ;;  %s822_s2 = inlined_call_operand.vmem [shape: f32[48,2], index: 2, kind: input, shape index: {}]   ;;  %s823_s3 = inlined_call_operand.vmem [shape: f32[2,48,48], index: 3, kind: input, shape index: {}]   ;;  %s824_s4 = inlined_call_operand.vmem [shape: f32[4,48], index: 4, kind: input, shape index: {}]   ;;  %s825_s5 = inlined_call_operand.vmem [shape: f32[48,4], index: 5, kind: input, shape index: {}]   ;;  %s826_s6 = inlined_call_operand.hbm [shape: f32[4,128], index: 6, kind: output, shape index: {0}]   ;;  %s827_s7 = inlined_call_operand.hbm [shape: f32[1,128], index: 7, kind: output, shape index: {1}]  }
   0x1   :  { %14 = vsyncpa [#allocation6], 0 }
   0x2   :  { %15 = vsyncpa [#allocation4], 0 }
   0x3   :  { %16 = vsyncpa [#allocation9], 0  ;;  %s22_s26 = sshll.u32 %s820_s0, 4  ;;  %s626_s27 = smov [#allocation2]   ;;  %s23_s26 = int_to_ptr.hbm [resolvable:$true] %s22_s26 }
   0x4   :  { %s24_s28 = sshll.u32 %s626_s27, 4  ;;  %s33_s8 = sshll.u32 %s821_s1, 4  ;;  %s25_s28 = int_to_ptr.vmem [resolvable:$true] %s24_s28  ;;  %s34_s8 = int_to_ptr.hbm [resolvable:$true] %s33_s8 }
   0x5   :  { %27 = dma.hbm_to_vmem [thread:$0]  %s23_s26, 32, %s25_s28, [#allocation3]  }
   0x6   :  { %s627_s9 = smov [#allocation5]  }
   0x7   :  { %s35_s10 = sshll.u32 %s627_s9, 4  ;;  %s36_s10 = int_to_ptr.vmem [resolvable:$true] %s35_s10 }
   0x8   :  { %38 = dma.hbm_to_vmem [thread:$0]  %s34_s8, 32, %s36_s10, [#allocation6]  }
   0x9   :  { %618 = dma.done.wait [#allocation3], 32  }
   0xa   :  { %619 = vsyncadd [#allocation3], 4294967264 }
   0xb   :  { %620 = dma.done.wait [#allocation6], 32  }
   0xc   :  { %621 = vsyncadd [#allocation6], 4294967264  ;;  %v628_v0 = vmov 0   ;;  %vm133_vm0 = vcmask 1041408   ;;  %vm114_vm1 = vcmask 15360   ;;  %v57_v2 = vld [vmem:[%s822_s2] sm:$0xff] }
   0xd   :  { %510 = vset.pattern.permute.xlu1 %v628_v0  ;;  %511 = vset.pattern.permute.xlu2 %v628_v0  ;;  %v680_v1 = vld [vmem:[#allocation2] sm:$0x3]  ;;  %v690_v3 = vld [vmem:[%s825_s5 + $0x18] sm:$0xff]  ;;  %v697_v4 = vld [vmem:[%s825_s5 + $0x8] sm:$0xff]  ;;  %v629_v19 = vmov 1   ;;  %vm214_vm8 = vcmask 392192  }
   0xe   :  { %509 = vset.pattern.permute.xlu0 %v628_v0  ;;  %469 = vmatpush.msk.msra.mxu0 %vm133_vm0, %v680_v1  ;;  %v703_v5 = vld [vmem:[%s825_s5 + $0x28] sm:$0xff]  ;;  %v712_v7 = vld [vmem:[%s825_s5 + $0x10] sm:$0xff]  ;;  %v717_v8 = vld [vmem:[%s825_s5] sm:$0xff]  ;;  %v630_v58 = vmov 2   ;;  %s447_s1 = sshll.u32 %s827_s7, 4  ;;  %s633_s11 = smov [#allocation7]   ;;  %s448_s1 = int_to_ptr.hbm [resolvable:$true] %s447_s1 }
   0xf   :  { %470 = vmatmul.msk.f32.vlgmr.msra.gmra.mxu0 %vm114_vm1, %v57_v2  ;;  %101 = vperm.xlu1 %510, %v690_v3   ;;  %v58_v6 = vld [vmem:[%s822_s2 + $0x8] sm:$0xff]  ;;  %v724_v9 = vld [vmem:[%s825_s5 + $0x20] sm:$0xff]  ;;  %v59_v10 = vld [vmem:[%s822_s2 + $0x10] sm:$0xff]  ;;  %s434_s12 = sshll.u32 %s633_s11, 4  ;;  %s436_s15 = sshll.u32 %s826_s6, 4  ;;  %s435_s12 = int_to_ptr.vmem [resolvable:$true] %s434_s12  ;;  %s437_s15 = int_to_ptr.hbm [resolvable:$true] %s436_s15 }
  0x10   :  { %91 = vperm.xlu2 %511, %v697_v4   ;;  %111 = vperm.xlu0 %509, %v703_v5   ;;  %v60_v11 = vld [vmem:[%s822_s2 + $0x18] sm:$0xff]  ;;  %v61_v12 = vld [vmem:[%s822_s2 + $0x20] sm:$0xff]  ;;  %v62_v13 = vld [vmem:[%s822_s2 + $0x28] sm:$0xff]  ;;  %s632_s2 = smov [#allocation8]  }
  0x11   :  { %v63_v44 = vld [vmem:[%s823_s3] sm:$0xff]  ;;  %v68_v45 = vld [vmem:[%s823_s3 + $0x28] sm:$0xff]  ;;  %v65_v48 = vld [vmem:[%s823_s3 + $0x10] sm:$0xff]  ;;  %s445_s10 = sshll.u32 %s632_s2, 4  ;;  %s446_s10 = int_to_ptr.vmem [resolvable:$true] %s445_s10 }
  0x12   :  { %v64_v47 = vld [vmem:[%s823_s3 + $0x8] sm:$0xff]  ;;  %v66_v49 = vld [vmem:[%s823_s3 + $0x18] sm:$0xff]  ;;  %v67_v50 = vld [vmem:[%s823_s3 + $0x20] sm:$0xff] }
  0x17   :  { %471 = vmatmul.msk.f32.gmra.mxu0 %vm114_vm1, %v58_v6  ;;  %96 = vperm.xlu1 %510, %v712_v7  }
  0x18   :  { %86 = vperm.xlu2 %511, %v717_v8   ;;  %106 = vperm.xlu0 %509, %v724_v9  }
  0x1f   :  { %472 = vmatmul.msk.f32.gmra.mxu0 %vm114_vm1, %v59_v10  ;;  %513 = vset.pattern.permute.xlu1 %v629_v19 }
  0x20   :  { %512 = vset.pattern.permute.xlu0 %v629_v19  ;;  %207 = vperm.xlu1 %513, %v724_v9  }
  0x21   :  { %211 = vperm.xlu0 %512, %v703_v5   ;;  %514 = vset.pattern.permute.xlu2 %v629_v19  ;;  %v468_v19 = vld [vmem:[%s823_s3 + $0x58] sm:$0xff] }
  0x22   :  { %203 = vperm.xlu2 %514, %v690_v3  }
  0x27   :  { %473 = vmatmul.msk.f32.gmra.mxu0 %vm114_vm1, %v60_v11 }
  0x28   :  { %199 = vperm.xlu1 %513, %v712_v7  }
  0x29   :  { %191 = vperm.xlu0 %512, %v717_v8  }
  0x2a   :  { %195 = vperm.xlu2 %514, %v697_v4  }
  0x2f   :  { %474 = vmatmul.msk.f32.gmra.mxu0 %vm114_vm1, %v61_v12 }
  0x30   :  { %515 = vset.pattern.permute.xlu1 %v630_v58 }
  0x31   :  { %517 = vset.pattern.permute.xlu0 %v630_v58  ;;  %307 = vperm.xlu1 %515, %v703_v5  }
  0x32   :  { %516 = vset.pattern.permute.xlu2 %v630_v58  ;;  %299 = vperm.xlu0 %517, %v690_v3  }
  0x33   :  { %303 = vperm.xlu2 %516, %v724_v9  }
  0x37   :  { %475 = vmatmul.msk.f32.gmra.mxu0 %vm114_vm1, %v62_v13 }
  0x39   :  { %295 = vperm.xlu1 %515, %v712_v7  }
  0x3b   :  { %291 = vperm.xlu2 %516, %v697_v4  }
  0x41   :  { %287 = vperm.xlu1 %515, %v717_v8  }
  0x6a   :  { %v92_v22 = vpop.permute.xlu2 %91 }
  0x72   :  { %v87_v32 = vpop.permute.xlu2 %86 }
  0x7c   :  { %v204_v61 = vpop.permute.xlu2 %203 }
  0x81   :  { %v102_v20 = vpop.permute.xlu1 %101 }
  0x82   :  { %v112_v18 = vpop.permute.xlu0 %111 }
  0x84   :  { %v196_v2 = vpop.permute.xlu2 %195 }
  0x89   :  { %v97_v25 = vpop.permute.xlu1 %96 }
  0x8a   :  { %v107_v23 = vpop.permute.xlu0 %106 }
  0x8c   :  { %v154_v14 = vpop.f32.mrf.mxu0 }
  0x8d   :  { %v155_v36 = vadd.f32 %v154_v14, %v87_v32  ;;  %v83_v32 = vld [vmem:[%s825_s5] sm:$0xf] }
  0x8f   :  { %v178_v42 = vmul.f32 0.2, %v155_v36  ;;  %vm172_vm7 = vcmp.gt.f32.partialorder %v155_v36, 0.0 }
  0x91   :  { %v184_v46 = vsel %vm172_vm7, %v155_v36, %v178_v42 }
  0x92   :  { %v208_v60 = vpop.permute.xlu1 %207 }
  0x93   :  { %v212_v52 = vpop.permute.xlu0 %211 }
  0x94   :  { %v157_v15 = vpop.f32.mrf.mxu0 }
  0x95   :  { %v158_v33 = vadd.f32 %v157_v15, %v92_v22  ;;  %v465_v22 = vld [vmem:[%s823_s3 + $0x40] sm:$0xff] }
  0x97   :  { %v179_v40 = vmul.f32 0.2, %v158_v33  ;;  %vm173_vm6 = vcmp.gt.f32.partialorder %v158_v33, 0.0 }
  0x99   :  { %v185_v43 = vsel %vm173_vm6, %v158_v33, %v179_v40 }
  0x9a   :  { %v200_v63 = vpop.permute.xlu1 %199 }
  0x9b   :  { %v192_v11 = vpop.permute.xlu0 %191 }
  0x9c   :  { %v160_v16 = vpop.f32.mrf.mxu0 }
  0x9d   :  { %v161_v29 = vadd.f32 %v160_v16, %v97_v25 }
  0x9f   :  { %v180_v38 = vmul.f32 0.2, %v161_v29  ;;  %vm174_vm5 = vcmp.gt.f32.partialorder %v161_v29, 0.0 }
  0xa1   :  { %v186_v41 = vsel %vm174_vm5, %v161_v29, %v180_v38 }
  0xa3   :  { %v308_v25 = vpop.permute.xlu1 %307 }
  0xa4   :  { %v163_v17 = vpop.f32.mrf.mxu0  ;;  %v300_v38 = vpop.permute.xlu0 %299 }
  0xa5   :  { %v164_v27 = vadd.f32 %v163_v17, %v102_v20 }
  0xa7   :  { %v181_v35 = vmul.f32 0.2, %v164_v27  ;;  %vm175_vm4 = vcmp.gt.f32.partialorder %v164_v27, 0.0 }
  0xa9   :  { %v187_v39 = vsel %vm175_vm4, %v164_v27, %v181_v35  ;;  %v304_v35 = vpop.permute.xlu2 %303 }
  0xab   :  { %v296_v36 = vpop.permute.xlu1 %295 }
  0xac   :  { %v166_v21 = vpop.f32.mrf.mxu0 }
  0xad   :  { %v167_v24 = vadd.f32 %v166_v21, %v107_v23  ;;  %v464_v21 = vld [vmem:[%s823_s3 + $0x38] sm:$0xff]  ;;  %v466_v23 = vld [vmem:[%s823_s3 + $0x48] sm:$0xff] }
  0xaf   :  { %v182_v31 = vmul.f32 0.2, %v167_v24  ;;  %vm176_vm3 = vcmp.gt.f32.partialorder %v167_v24, 0.0 }
  0xb1   :  { %v188_v37 = vsel %vm176_vm3, %v167_v24, %v182_v31  ;;  %v467_v24 = vld [vmem:[%s823_s3 + $0x50] sm:$0xff]  ;;  %v292_v40 = vpop.permute.xlu2 %291 }
  0xb4   :  { %v169_v26 = vpop.f32.mrf.mxu0 }
  0xb5   :  { %v170_v28 = vadd.f32 %v169_v26, %v112_v18  ;;  %v463_v18 = vld [vmem:[%s823_s3 + $0x30] sm:$0xff] }
  0xb7   :  { %vm177_vm2 = vcmp.gt.f32.partialorder %v170_v28, 0.0  ;;  %v183_v30 = vmul.f32 0.2, %v170_v28 }
  0xb9   :  { %v189_v34 = vsel %vm177_vm2, %v170_v28, %v183_v30 }
  0xba   :  { %243 = vmatpush.msra.mxu1 %v189_v34  ;;  %489 = vmatpush.msra.mxu3 %v189_v34  ;;  %v631_v34 = vmov 3  }
  0xbb   :  { %518 = vset.pattern.permute.xlu2 %v631_v34  ;;  %519 = vset.pattern.permute.xlu0 %v631_v34 }
  0xbc   :  { %244 = vmatpush.msra.mxu1 %v188_v37  ;;  %490 = vmatpush.msra.mxu3 %v188_v37 }
  0xbd   :  { %383 = vperm.xlu2 %518, %v83_v32  }
  0xbe   :  { %245 = vmatpush.msra.mxu1 %v187_v39  ;;  %491 = vmatpush.msra.mxu3 %v187_v39 }
  0xc0   :  { %246 = vmatpush.msra.mxu1 %v186_v41  ;;  %492 = vmatpush.msra.mxu3 %v186_v41 }
  0xc2   :  { %247 = vmatpush.msra.mxu1 %v185_v43  ;;  %493 = vmatpush.msra.mxu3 %v185_v43 }
  0xc4   :  { %248 = vmatpush.msra.mxu1 %v184_v46  ;;  %494 = vmatpush.msra.mxu3 %v184_v46 }
  0xc5   :  { %476 = vmatmul.msk.f32.vlgmr.msra.gmra.mxu1 %vm214_vm8, %v63_v44  ;;  %481 = vmatmul.msk.f32.vlgmr.msra.gmra.mxu3 %vm214_vm8, %v68_v45  ;;  %v288_v44 = vpop.permute.xlu1 %287 }
  0xcd   :  { %477 = vmatmul.msk.f32.gmra.mxu1 %vm214_vm8, %v64_v47 }
  0xd5   :  { %478 = vmatmul.msk.f32.gmra.mxu1 %vm214_vm8, %v65_v48 }
  0xdd   :  { %479 = vmatmul.msk.f32.gmra.mxu1 %vm214_vm8, %v66_v49 }
  0xe5   :  { %480 = vmatmul.msk.f32.gmra.mxu1 %vm214_vm8, %v67_v50 }
 0x117   :  { %v384_v58 = vpop.permute.xlu2 %383 }
 0x142   :  { %v250_v51 = vpop.f32.mrf.mxu1 }
 0x143   :  { %v251_v13 = vadd.f32 %v250_v51, %v192_v11 }
 0x145   :  { %v274_v16 = vmul.f32 0.2, %v251_v13  ;;  %vm268_vm14 = vcmp.gt.f32.partialorder %v251_v13, 0.0 }
 0x147   :  { %v280_v20 = vsel %vm268_vm14, %v251_v13, %v274_v16 }
 0x148   :  { %v265_v53 = vpop.f32.mrf.mxu3 }
 0x149   :  { %v266_v54 = vadd.f32 %v265_v53, %v212_v52 }
 0x14a   :  { %v253_v55 = vpop.f32.mrf.mxu1 }
 0x14b   :  { %vm273_vm9 = vcmp.gt.f32.partialorder %v266_v54, 0.0  ;;  %v279_v56 = vmul.f32 0.2, %v266_v54  ;;  %v254_v12 = vadd.f32 %v253_v55, %v196_v2 }
 0x14d   :  { %v285_v57 = vsel %vm273_vm9, %v266_v54, %v279_v56  ;;  %v275_v7 = vmul.f32 0.2, %v254_v12  ;;  %vm269_vm13 = vcmp.gt.f32.partialorder %v254_v12, 0.0  ;;  %v76_v56 = vld [vmem:[%s824_s4] sm:$0xf] }
 0x14e   :  { %338 = vmatpush.msra.mxu2 %v285_v57  ;;  %495 = vmatpush.msrb.mxu3 %v285_v57 }
 0x14f   :  { %v281_v17 = vsel %vm269_vm13, %v254_v12, %v275_v7 }
 0x152   :  { %v256_v59 = vpop.f32.mrf.mxu1 }
 0x153   :  { %v257_v10 = vadd.f32 %v256_v59, %v200_v63 }
 0x155   :  { %v276_v15 = vmul.f32 0.2, %v257_v10  ;;  %vm270_vm12 = vcmp.gt.f32.partialorder %v257_v10, 0.0 }
 0x157   :  { %v282_v8 = vsel %vm270_vm12, %v257_v10, %v276_v15 }
 0x15a   :  { %v259_v62 = vpop.f32.mrf.mxu1 }
 0x15b   :  { %v260_v0 = vadd.f32 %v259_v62, %v204_v61 }
 0x15d   :  { %v277_v9 = vmul.f32 0.2, %v260_v0  ;;  %vm271_vm11 = vcmp.gt.f32.partialorder %v260_v0, 0.0 }
 0x15f   :  { %v283_v4 = vsel %vm271_vm11, %v260_v0, %v277_v9 }
 0x162   :  { %v262_v6 = vpop.f32.mrf.mxu1 }
 0x163   :  { %v263_v5 = vadd.f32 %v262_v6, %v208_v60  ;;  %v56_v6 = vld [vmem:[#allocation5] sm:$0x3] }
 0x165   :  { %vm272_vm10 = vcmp.gt.f32.partialorder %v263_v5, 0.0  ;;  %v278_v3 = vmul.f32 0.2, %v263_v5 }
 0x167   :  { %v284_v14 = vsel %vm272_vm10, %v263_v5, %v278_v3 }
 0x168   :  { %339 = vmatpush.msra.mxu2 %v284_v14  ;;  %496 = vmatpush.msrb.mxu3 %v284_v14 }
 0x16a   :  { %340 = vmatpush.msra.mxu2 %v283_v4  ;;  %497 = vmatpush.msrb.mxu3 %v283_v4 }
 0x16c   :  { %341 = vmatpush.msra.mxu2 %v282_v8  ;;  %498 = vmatpush.msrb.mxu3 %v282_v8 }
 0x16e   :  { %342 = vmatpush.msra.mxu2 %v281_v17  ;;  %499 = vmatpush.msrb.mxu3 %v281_v17 }
 0x170   :  { %343 = vmatpush.msra.mxu2 %v280_v20  ;;  %500 = vmatpush.msrb.mxu3 %v280_v20 }
 0x171   :  { %482 = vmatmul.msk.f32.vlgmr.msra.gmra.mxu2 %vm214_vm8, %v463_v18  ;;  %487 = vmatmul.msk.f32.vlgmr.msrb.gmra.mxu3 %vm214_vm8, %v468_v19 }
 0x179   :  { %483 = vmatmul.msk.f32.gmra.mxu2 %vm214_vm8, %v464_v21 }
 0x181   :  { %484 = vmatmul.msk.f32.gmra.mxu2 %vm214_vm8, %v465_v22 }
 0x189   :  { %485 = vmatmul.msk.f32.gmra.mxu2 %vm214_vm8, %v466_v23 }
 0x191   :  { %486 = vmatmul.msk.f32.gmra.mxu2 %vm214_vm8, %v467_v24 }
 0x1f4   :  { %v345_v26 = vpop.f32.mrf.mxu2  ;;  %v360_v27 = vpop.f32.mrf.mxu3 }
 0x1f5   :  { %v361_v28 = vadd.f32 %v360_v27, %v308_v25  ;;  %v346_v48 = vadd.f32 %v345_v26, %v288_v44 }
 0x1f7   :  { %vm368_vm15 = vcmp.gt.f32.partialorder %v361_v28, 0.0  ;;  %v374_v29 = vmul.f32 0.2, %v361_v28  ;;  %v369_v53 = vmul.f32 0.2, %v346_v48  ;;  %vm363_vm5 = vcmp.gt.f32.partialorder %v346_v48, 0.0 }
 0x1f9   :  { %v380_v30 = vsel %vm368_vm15, %v361_v28, %v374_v29  ;;  %v375_v57 = vsel %vm363_vm5, %v346_v48, %v369_v53 }
 0x1fa   :  { %399 = vmatpush.msra.mxu3 %v380_v30 }
 0x1fc   :  { %v348_v31 = vpop.f32.mrf.mxu2 }
 0x1fd   :  { %v349_v45 = vadd.f32 %v348_v31, %v292_v40 }
 0x1ff   :  { %v370_v51 = vmul.f32 0.2, %v349_v45  ;;  %vm364_vm4 = vcmp.gt.f32.partialorder %v349_v45, 0.0 }
 0x201   :  { %v376_v55 = vsel %vm364_vm4, %v349_v45, %v370_v51 }
 0x204   :  { %v351_v33 = vpop.f32.mrf.mxu2 }
 0x205   :  { %v352_v42 = vadd.f32 %v351_v33, %v296_v36 }
 0x207   :  { %v371_v49 = vmul.f32 0.2, %v352_v42  ;;  %vm365_vm3 = vcmp.gt.f32.partialorder %v352_v42, 0.0 }
 0x209   :  { %v377_v54 = vsel %vm365_vm3, %v352_v42, %v371_v49 }
 0x20c   :  { %v354_v37 = vpop.f32.mrf.mxu2 }
 0x20d   :  { %v355_v39 = vadd.f32 %v354_v37, %v300_v38 }
 0x20f   :  { %v372_v46 = vmul.f32 0.2, %v355_v39  ;;  %vm366_vm2 = vcmp.gt.f32.partialorder %v355_v39, 0.0 }
 0x211   :  { %v378_v52 = vsel %vm366_vm2, %v355_v39, %v372_v46 }
 0x214   :  { %v357_v41 = vpop.f32.mrf.mxu2 }
 0x215   :  { %v358_v43 = vadd.f32 %v357_v41, %v304_v35 }
 0x217   :  { %v373_v47 = vmul.f32 0.2, %v358_v43  ;;  %vm367_vm1 = vcmp.gt.f32.partialorder %v358_v43, 0.0 }
 0x219   :  { %v379_v50 = vsel %vm367_vm1, %v358_v43, %v373_v47 }
 0x21a   :  { %400 = vmatpush.msra.mxu3 %v379_v50 }
 0x21c   :  { %401 = vmatpush.msra.mxu3 %v378_v52 }
 0x21e   :  { %402 = vmatpush.msra.mxu3 %v377_v54 }
 0x220   :  { %403 = vmatpush.msra.mxu3 %v376_v55 }
 0x222   :  { %404 = vmatpush.msra.mxu3 %v375_v57 }
 0x223   :  { %488 = vmatmul.msk.f32.vlgmr.msra.gmra.mxu3 %vm214_vm8, %v76_v56 }
 0x2a6   :  { %v406_v59 = vpop.f32.mrf.mxu3 }
 0x2a7   :  { %v407_v60 = vadd.f32 %v406_v59, %v384_v58 }
 0x2a9   :  { %v409_v61 = vmul.f32 1.442695, %v407_v60  ;;  %v421_v62 = vsel %vm133_vm0, %v407_v60, 0.0  ;;  %v413_v12 = vrot.slane %v407_v60, 2 }
 0x2aa   :  { %v422_v63 = vrot.slane %v421_v62, 4 }
 0x2ab   :  { %520 = vpow2.f32 %v409_v61 }
 0x2ac   :  { %v423_v0 = vadd.f32 %v422_v63, %v421_v62 }
 0x2ae   :  { %v424_v2 = vrot.slane %v423_v0, 2 }
 0x2b0   :  { %v425_v10 = vadd.f32 %v424_v2, %v423_v0 }
 0x2b1   :  { %v521_v5 = vpop.eup %520 }
 0x2b2   :  { %v411_v11 = vmul.f32 %v521_v5, %v56_v6  ;;  %v426_v3 = vrot.slane %v425_v10, 1 }
 0x2b4   :  { %v415_v9 = vadd.f32 %v413_v12, %v411_v11  ;;  %v427_v13 = vadd.f32 %v426_v3, %v425_v10 }
 0x2b6   :  { %v417_v14 = vrot.slane %v415_v9, 6  ;;  %428 = vst [vmem:[#allocation8] sm:$0x1] %v427_v13 }
 0x2b7   :  { %450 = dma.vmem_to_hbm [thread:$0]  %s446_s10, 16, %s448_s1, [#allocation9]  }
 0x2b8   :  { %v419_v15 = vsel %vm133_vm0, %v680_v1, %v417_v14 }
 0x2b9   :  { %420 = vst [vmem:[#allocation7] sm:$0xf] %v419_v15 }
 0x2ba   :  { %439 = dma.vmem_to_hbm [thread:$0]  %s435_s12, 64, %s437_s15, [#allocation4]  }
 0x2bb   :  { %622 = dma.done.wait [#allocation4], 64  }
 0x2bc   :  { %623 = vsyncadd [#allocation4], 4294967232 }
 0x2bd   :  { %624 = dma.done.wait [#allocation9], 16  }
 0x2be   :  { %625 = vsyncadd [#allocation9], 4294967280 }
 0x2bf   :  { %459 = vsyncpa [#allocation3], 1 }
 0x2c0   :  { %460 = vsyncpa [#allocation6], 1 }
 0x2c1   :  { %461 = vsyncpa [#allocation4], 1 }
 0x2c2   :  { %462 = vsyncpa [#allocation9], 1 }

</bundles_post_ra>
